<compile_context>
chip_gen: v5e
topology: v5e:2x2
jax: 0.10.0
libtpu: 0.0.40
codegen_flags: <defaults>
</compile_context>

<pallas_src>
import jax
import jax.numpy as jnp
from jax.experimental import pallas as pl
from jax.experimental.pallas import tpu as pltpu


def _round_up(n, m):
    return ((n + m - 1) // m) * m


def encoder_kernel(xe_ref, w1b1_ref, wmvb_ref, out_ref):
    """xe_ref = [x | 1 | eps]; out_ref[:, :3L] = [mean | log_var | z], rest 0."""
    d_in_p1 = w1b1_ref.shape[0]            # D_in + 1
    hidden = wmvb_ref.shape[0] - 1         # H
    latent = wmvb_ref.shape[1] // 2        # L

    # Lane slices of the single packed input slab (within-vreg, cheap).
    xb = xe_ref[:, :d_in_p1]                              # (TB, D_in+1) = [x | 1]
    eps = xe_ref[:, d_in_p1:d_in_p1 + latent]             # (TB, L), U[0,1)

    # h = relu([x | 1] @ [W1 ; b1])  -- bias folded into the MXU op.
    h = jnp.maximum(
        jnp.dot(xb, w1b1_ref[...], preferred_element_type=jnp.float32), 0.0)

    # [mean | log_var] = h @ [Wm | Wv] + [bm | bv]  (single fused matmul;
    # bias row read as a (1, 2L) ref view, broadcast-added on sublanes).
    mv = jnp.dot(h, wmvb_ref[:hidden, :], preferred_element_type=jnp.float32)
    mv = mv + wmvb_ref[hidden:, :]

    mean = mv[:, :latent]
    log_var = mv[:, latent:]

    # z = mean + exp(0.5 * log_var) * eps,  eps ~ U[0,1) (torch.rand_like)
    z = mean + jnp.exp(0.5 * log_var) * eps

    # Output order [mean | log_var | z | 0-pad]: mv stays lane-contiguous.
    pad = out_ref.shape[1] - 3 * latent
    pieces = [mv, z]
    if pad:
        pieces.append(jnp.zeros((z.shape[0], pad), jnp.float32))
    out_ref[...] = jnp.concatenate(pieces, axis=-1).astype(out_ref.dtype)


def pack_params(params):
    """One-time packing: one VMEM slab per layer."""
    w1b1 = jnp.concatenate([params["w1"], params["b1"]], axis=0)   # (D_in+1, H)
    wmv = jnp.concatenate([params["wm"], params["wv"]], axis=1)    # (H, 2L)
    bmv = jnp.concatenate([params["bm"], params["bv"]], axis=1)    # (1, 2L)
    wmvb = jnp.concatenate([wmv, bmv], axis=0)                     # (H+1, 2L)
    return {
        "w1b1": w1b1,
        "wmvb": wmvb,
        "input_dim": params["w1"].shape[0],
        "hidden_dim": params["w1"].shape[1],
        "latent_dim": params["wm"].shape[1],
    }


def encoder_forward(x, packed, eps):
    B, d_in = x.shape
    H = packed["hidden_dim"]
    L = packed["latent_dim"]
    out_w = _round_up(3 * L, 128)   # lane-dense output -> single unmasked store

    # Fold eps and the bias-ones column into ONE lane-dense input slab.
    xe = jnp.concatenate(
        [x, jnp.ones((B, 1), x.dtype), eps.astype(x.dtype)], axis=-1)
    slab_w = xe.shape[1]                                   # D_in + 1 + L

    # Batch grid: shards across TensorCores on v7x when B is large; at small B
    # it degenerates to a single gridless iteration. Weights stay VMEM-resident.
    TB = 128 if (B > 128 and B % 128 == 0) else B
    grid = (B // TB,)

    flops = 2 * B * ((d_in + 1) * H + (H + 1) * 2 * L)
    bytes_accessed = 4 * (xe.size + packed["w1b1"].size
                          + packed["wmvb"].size + B * out_w)
    cost = pl.CostEstimate(flops=flops, transcendentals=B * L,
                           bytes_accessed=bytes_accessed)

    out = pl.pallas_call(
        encoder_kernel,
        out_shape=jax.ShapeDtypeStruct((B, out_w), jnp.float32),
        grid_spec=pltpu.PrefetchScalarGridSpec(
            num_scalar_prefetch=0,
            grid=grid,
            in_specs=[
                pl.BlockSpec((TB, slab_w), lambda i: (i, 0)),       # [x|1|eps]
                pl.BlockSpec((d_in + 1, H), lambda i: (0, 0)),      # [W1; b1]
                pl.BlockSpec((H + 1, 2 * L), lambda i: (0, 0)),     # [Wm|Wv; bm|bv]
            ],
            out_specs=pl.BlockSpec((TB, out_w), lambda i: (i, 0)),
        ),
        compiler_params=pltpu.CompilerParams(
            dimension_semantics=("parallel",)),
        cost_estimate=cost,
    )(xe, packed["w1b1"], packed["wmvb"])

    mean = out[:, :L]
    log_var = out[:, L:2 * L]
    z = out[:, 2 * L:3 * L]
    return z, mean, log_var


def init_params(key, input_dim, hidden_dim, latent_dim):
    """Deterministic parameter init (uniform +-1/sqrt(fan_in), like nn.Linear)."""
    ks = jax.random.split(key, 6)

    def lin(kw, kb, fan_in, fan_out):
        bound = 1.0 / jnp.sqrt(jnp.float32(fan_in))
        w = jax.random.uniform(kw, (fan_in, fan_out), jnp.float32, -bound, bound)
        b = jax.random.uniform(kb, (1, fan_out), jnp.float32, -bound, bound)
        return w, b

    w1, b1 = lin(ks[0], ks[1], input_dim, hidden_dim)
    wm, bm = lin(ks[2], ks[3], hidden_dim, latent_dim)
    wv, bv = lin(ks[4], ks[5], hidden_dim, latent_dim)
    return {"w1": w1, "b1": b1, "wm": wm, "bm": bm, "wv": wv, "bv": bv}


if __name__ == "__main__":
    key = jax.random.PRNGKey(0)
    k_param, k_x, k_eps = jax.random.split(key, 3)

    batch, input_dim, hidden_dim, latent_dim = 8, 32, 64, 16

    params = init_params(k_param, input_dim, hidden_dim, latent_dim)
    packed = pack_params(params)
    x = jax.random.normal(k_x, (batch, input_dim), dtype=jnp.float32)
    # TODO(synk): torch.rand_like is emulated by host-side jax.random.uniform;
    # pltpu.prng_* has no portable/interpret lowering for in-kernel RNG here.
    eps = jax.random.uniform(k_eps, (batch, latent_dim), dtype=jnp.float32)

    z, mean, log_var = encoder_forward(x, packed, eps)
    jax.block_until_ready((z, mean, log_var))

    # Pure-JAX reference (mirrors PyTorch Encoder.forward exactly).
    h_ref = jnp.maximum(x @ params["w1"] + params["b1"], 0.0)
    mean_ref = h_ref @ params["wm"] + params["bm"]
    logvar_ref = h_ref @ params["wv"] + params["bv"]
    z_ref = mean_ref + jnp.exp(0.5 * logvar_ref) * eps

    assert z.shape == (batch, latent_dim)
    assert mean.shape == (batch, latent_dim)
    assert log_var.shape == (batch, latent_dim)
    assert bool(jnp.allclose(mean, mean_ref, atol=1e-5, rtol=1e-5))
    assert bool(jnp.allclose(log_var, logvar_ref, atol=1e-5, rtol=1e-5))
    assert bool(jnp.allclose(z, z_ref, atol=1e-5, rtol=1e-5))

    print("KERNEL_OK")
</pallas_src>

<mosaic_0001>
module attributes {stable_mosaic.version = 11 : i64} {
  func.func @encoder_kernel(%arg0: i32, %arg1: memref<8x49xf32, #tpu.memory_space<vmem>>, %arg2: memref<33x64xf32, #tpu.memory_space<vmem>>, %arg3: memref<65x32xf32, #tpu.memory_space<vmem>>, %arg4: memref<8x128xf32, #tpu.memory_space<vmem>>) attributes {dimension_semantics = [#tpu.dimension_semantics<parallel>], iteration_bounds = array<i64: 1>, scalar_prefetch = 0 : i64, scratch_operands = 0 : i64, tpu.core_type = #tpu.core_type<tc>, window_params = [{transform_indices = @transform_0, window_bounds = array<i64: 8, 49>}, {pipeline_mode = #tpu.pipeline_mode<synchronous>, transform_indices = @transform_1, window_bounds = array<i64: 33, 64>}, {pipeline_mode = #tpu.pipeline_mode<synchronous>, transform_indices = @transform_2, window_bounds = array<i64: 65, 32>}, {transform_indices = @transform_3, window_bounds = array<i64: 8, 128>}]} {
    %c0 = arith.constant 0 : index
    %c0_0 = arith.constant 0 : index
    %0 = vector.load %arg1[%c0, %c0_0] : memref<8x49xf32, #tpu.memory_space<vmem>>, vector<8x33xf32>
    %c0_1 = arith.constant 0 : index
    %c33 = arith.constant 33 : index
    %1 = vector.load %arg1[%c0_1, %c33] : memref<8x49xf32, #tpu.memory_space<vmem>>, vector<8x16xf32>
    %c0_2 = arith.constant 0 : index
    %c0_3 = arith.constant 0 : index
    %2 = vector.load %arg2[%c0_2, %c0_3] : memref<33x64xf32, #tpu.memory_space<vmem>>, vector<33x64xf32>
    %cst = arith.constant dense<0.000000e+00> : vector<8x64xf32>
    %3 = tpu.matmul %0, %2, %cst {dimension_numbers = #tpu.dot_dimension_numbers<[1], [0], [0], [1], [0, 0, 1, 1], [], []>} : vector<8x33xf32>, vector<33x64xf32>, vector<8x64xf32> -> vector<8x64xf32>
    %cst_4 = arith.constant 0.000000e+00 : f32
    %4 = vector.broadcast %cst_4 : f32 to vector<8x64xf32>
    %5 = arith.maximumf %3, %4 : vector<8x64xf32>
    %c0_5 = arith.constant 0 : index
    %c0_6 = arith.constant 0 : index
    %6 = vector.load %arg3[%c0_5, %c0_6] : memref<65x32xf32, #tpu.memory_space<vmem>>, vector<64x32xf32>
    %cst_7 = arith.constant dense<0.000000e+00> : vector<8x32xf32>
    %7 = tpu.matmul %5, %6, %cst_7 {dimension_numbers = #tpu.dot_dimension_numbers<[1], [0], [0], [1], [0, 0, 1, 1], [], []>} : vector<8x64xf32>, vector<64x32xf32>, vector<8x32xf32> -> vector<8x32xf32>
    %c64 = arith.constant 64 : index
    %c0_8 = arith.constant 0 : index
    %8 = vector.load %arg3[%c64, %c0_8] : memref<65x32xf32, #tpu.memory_space<vmem>>, vector<1x32xf32>
    %9 = vector.broadcast %8 : vector<1x32xf32> to vector<8x32xf32>
    %10 = arith.addf %7, %9 : vector<8x32xf32>
    %11 = vector.extract_strided_slice %10 {offsets = [0, 0], sizes = [8, 16], strides = [1, 1]} : vector<8x32xf32> to vector<8x16xf32>
    %12 = vector.extract_strided_slice %10 {offsets = [0, 16], sizes = [8, 16], strides = [1, 1]} : vector<8x32xf32> to vector<8x16xf32>
    %cst_9 = arith.constant 5.000000e-01 : f32
    %13 = vector.broadcast %cst_9 : f32 to vector<8x16xf32>
    %14 = arith.mulf %13, %12 : vector<8x16xf32>
    %15 = math.exp %14 : vector<8x16xf32>
    %16 = arith.mulf %15, %1 : vector<8x16xf32>
    %17 = arith.addf %11, %16 : vector<8x16xf32>
    %cst_10 = arith.constant 0.000000e+00 : f32
    %18 = vector.broadcast %cst_10 : f32 to vector<8x80xf32>
    %19 = tpu.concatenate %10, %17, %18 in 1 : vector<8x32xf32>, vector<8x16xf32>, vector<8x80xf32> -> vector<8x128xf32>
    %c0_11 = arith.constant 0 : index
    %c0_12 = arith.constant 0 : index
    %20 = vector.load %arg4[%c0_11, %c0_12] : memref<8x128xf32, #tpu.memory_space<vmem>>, vector<8x128xf32>
    tpu.vector_store %arg4[%c0_11, %c0_12], %19 {strides = array<i32>} : memref<8x128xf32, #tpu.memory_space<vmem>>, vector<8x128xf32>,
    return
  }
  func.func @transform_0(%arg0: i32) -> (i32, i32) {
    %c0_i32 = arith.constant 0 : i32
    %c0_i32_0 = arith.constant 0 : i32
    return %arg0, %c0_i32 : i32, i32
  }
  func.func @transform_1(%arg0: i32) -> (i32, i32) {
    %c0_i32 = arith.constant 0 : i32
    %c0_i32_0 = arith.constant 0 : i32
    %c0_i32_1 = arith.constant 0 : i32
    return %c0_i32, %c0_i32_0 : i32, i32
  }
  func.func @transform_2(%arg0: i32) -> (i32, i32) {
    %c0_i32 = arith.constant 0 : i32
    %c0_i32_0 = arith.constant 0 : i32
    %c0_i32_1 = arith.constant 0 : i32
    return %c0_i32, %c0_i32_0 : i32, i32
  }
  func.func @transform_3(%arg0: i32) -> (i32, i32) {
    %c0_i32 = arith.constant 0 : i32
    %c0_i32_0 = arith.constant 0 : i32
    return %arg0, %c0_i32 : i32, i32
  }
}

</mosaic_0001>

<bundles_post_ra>
// kernel: tpu_custom_call.1
= control target key start
LH: loop header
LB: loop body
LE: loop exit
PB: predicated region body
PF: predicated region fallthrough
CT: control target
= control target key end

     0   :  { %vm25_vm0 = vcmask 1040384   ;;  %s229_s0 = inlined_call_operand.vmem [shape: f32[8,49], index: 0, kind: input, shape index: {}]   ;;  %s230_s1 = inlined_call_operand.vmem [shape: f32[33,64], index: 1, kind: input, shape index: {}]   ;;  %s231_s2 = inlined_call_operand.vmem [shape: f32[65,32], index: 2, kind: input, shape index: {}]   ;;  %s232_s3 = inlined_call_operand.hbm [shape: f32[8,128], index: 3, kind: output, shape index: {}]  }
   0x1   :  { %v20_v0 = vld [vmem:[%s230_s1 + $0x20] sm:$0x1]  ;;  %v19_v1 = vld [vmem:[%s230_s1 + $0x18] sm:$0xff]  ;;  %v18_v2 = vld [vmem:[%s230_s1 + $0x10] sm:$0xff] }
   0x2   :  { %121 = vmatpush.msk.msra.mxu0 %vm25_vm0, %v20_v0  ;;  %v57_v3 = vld [vmem:[%s231_s2 + $0x38] sm:$0xff]  ;;  %v56_v4 = vld [vmem:[%s231_s2 + $0x30] sm:$0xff]  ;;  %v17_v5 = vld [vmem:[%s230_s1 + $0x8] sm:$0xff] }
   0x3   :  { %72 = vmatpush.msra.mxu1 %v57_v3  ;;  %v55_v6 = vld [vmem:[%s231_s2 + $0x28] sm:$0xff] }
   0x4   :  { %41 = vmatpush.msra.mxu0 %v19_v1 }
   0x5   :  { %8 = vsyncpa [#allocation3], 0  ;;  %73 = vmatpush.msra.mxu1 %v56_v4  ;;  %v16_v7 = vld [vmem:[%s230_s1] sm:$0xff]  ;;  %vm21_vm1 = vcmask 269312   ;;  %v53_v10 = vld [vmem:[%s231_s2 + $0x18] sm:$0xff]  ;;  %s157_s8 = smov 111  }
   0x6   :  { %42 = vmatpush.msra.mxu0 %v18_v2  ;;  %v54_v8 = vld [vmem:[%s231_s2 + $0x20] sm:$0xff]  ;;  %v52_v11 = vld [vmem:[%s231_s2 + $0x10] sm:$0xff]  ;;  %v51_v12 = vld [vmem:[%s231_s2 + $0x8] sm:$0xff]  ;;  %vm60_vm2 = vcmask 523264   ;;  %s158_s14 = smov 112   ;;  %s159_s15 = smov 32  }
   0x7   :  { %v15_v9 = vld [vmem:[%s229_s0] sm:$0xff]  ;;  %74 = vmatpush.msra.mxu1 %v55_v6  ;;  %vm100_vm3 = vcmask 261120   ;;  %s160_s16 = smov [#allocation2]   ;;  %vm102_vm4 = vcmask 392192  }
   0x8   :  { %43 = vmatpush.msra.mxu0 %v17_v5  ;;  %87 = vrot.lane.b32.xlu0 %v15_v9, %s157_s8  ;;  %v50_v13 = vld [vmem:[%s231_s2] sm:$0xff]  ;;  %s110_s17 = sshll.u32 %s160_s16, 4  ;;  %s111_s17 = int_to_ptr.vmem [resolvable:$true] %s110_s17 }
   0x9   :  { %75 = vmatpush.msra.mxu1 %v54_v8  ;;  %v128_v16 = vld [vmem:[%s231_s2 + $0x40] ss:$0 sm:$0xff]  ;;  %s112_s2 = sshll.u32 %s232_s3, 4  ;;  %s113_s2 = int_to_ptr.hbm [resolvable:$true] %s112_s2 }
   0xa   :  { %44 = vmatpush.msra.mxu0 %v16_v7 }
   0xb   :  { %122 = vmatmul.msk.f32.vlgmr.msra.gmra.mxu0 %vm21_vm1, %v15_v9  ;;  %76 = vmatpush.msra.mxu1 %v53_v10 }
   0xd   :  { %77 = vmatpush.msra.mxu1 %v52_v11 }
   0xf   :  { %78 = vmatpush.msra.mxu1 %v51_v12 }
  0x11   :  { %79 = vmatpush.msra.mxu1 %v50_v13 }
  0x7a   :  { %v88_v21 = vpop.permute.xlu0 %87 }
  0x88   :  { %v46_v14 = vpop.f32.mrf.mxu0 }
  0x89   :  { %v49_v15 = vmax.f32 %v46_v14, 0.0 }
  0x8b   :  { %123 = vmatmul.msk.f32.vlgmr.msra.gmra.mxu1 %vm60_vm2, %v49_v15 }
 0x108   :  { %v81_v17 = vpop.f32.mrf.mxu1 }
 0x109   :  { %v82_v18 = vadd.f32 %v128_v16, %v81_v17 }
 0x10b   :  { %v84_v19 = vmul.f32 0.5, %v82_v18 }
 0x10d   :  { %v85_v20 = vmul.f32 1.442695, %v84_v19 }
 0x10f   :  { %129 = vpow2.f32 %v85_v20 }
 0x115   :  { %v130_v22 = vpop.eup %129 }
 0x116   :  { %v90_v23 = vmul.f32 %v130_v22, %v88_v21 }
 0x118   :  { %92 = vrot.lane.b32.xlu0 %v90_v23, %s158_s14 }
 0x18a   :  { %v93_v24 = vpop.permute.xlu0 %92 }
 0x18b   :  { %v95_v25 = vadd.f32 %v93_v24, %v82_v18 }
 0x18d   :  { %97 = vrot.lane.b32.xlu1 %v95_v25, %s159_s15 }
 0x1ff   :  { %v98_v26 = vpop.permute.xlu1 %97 }
 0x200   :  { %v101_v27 = vsel %vm100_vm3, %v82_v18, %v98_v26 }
 0x201   :  { %v103_v28 = vsel %vm102_vm4, %v101_v27, 0.0 }
 0x202   :  { %104 = vst [vmem:[#allocation2] sm:$0xff] %v103_v28 }
 0x203   :  { %115 = dma.vmem_to_hbm [thread:$0]  %s111_s17, 128, %s113_s2, [#allocation3]  }
 0x204   :  { %155 = dma.done.wait [#allocation3], 128  }
 0x205   :  { %156 = vsyncadd [#allocation3], 4294967168 }
 0x206   :  { %120 = vsyncpa [#allocation3], 1 }

</bundles_post_ra>
